<compile_context>
chip_gen: v7x
topology: tpu7x:2x2x1
jax: 0.10.0
libtpu: 0.0.40
codegen_flags: <defaults>
</compile_context>

<pallas_src>
import functools

import jax
import jax.numpy as jnp
from jax.experimental import pallas as pl
from jax.experimental.pallas import tpu as pltpu

EPS = 1e-5
_L_TILE_TARGET = 2048          # lanes per block (review: 2048-4096 where VMEM allows)
_MAX_NB = 8                    # cap on batch rows per grid step (bounds in-kernel unroll)


def _round_up(x, m):
    return (x + m - 1) // m * m


def _cdiv(a, b):
    return (a + b - 1) // b


def _vmem_limit_bytes():
    """Per-chip scoped-VMEM budget: ~75% of physical VMEM, capped at 96 MiB.
    v5e/v6e (128 MiB) -> 96 MiB; v7x (64 MiB) -> 48 MiB; unknown -> 48 MiB."""
    try:
        cap = pltpu.get_tpu_info().vmem_capacity_bytes
    except Exception:
        cap = 64 * 1024 * 1024
    return min(int(cap) * 3 // 4, 96 * 1024 * 1024)


def _pick_l_tile(L, target):
    """Return (Lt, Lp): tile size (multiple of 128) and padded length (multiple of Lt)."""
    target = max(128, (target // 128) * 128)
    Lp = _round_up(L, 128)
    if Lp <= target:
        return Lp, Lp
    # Prefer a divisor of Lp in [target/2, target] (no extra padding needed).
    t = target
    while t >= max(128, target // 2):
        if Lp % t == 0:
            return t, Lp
        t -= 128
    # Otherwise pad L up to a multiple of `target` (bounded waste, keeps big tiles).
    return target, _round_up(L, target)


def _choose_tiles(N, C_out, C_in, L, x_bytes, cond_bytes, out_bytes, block_budget):
    """Pick (Nb, Np, Lt, Lp): batch rows / padded batch, L tile / padded L."""
    per_l = C_out * (x_bytes + out_bytes) + C_in * cond_bytes   # bytes per row per L elem
    # Nb: enough batch rows for full sublane occupancy when C_out is small.
    sub = 8 if x_bytes >= 4 else 16
    nb = min(max(1, _cdiv(sub, C_out)), _MAX_NB, max(N, 1))
    # Lt: as large as possible within the (double-buffered) block budget.
    lt_cap = max(128, (block_budget // max(2 * nb * per_l, 1)) // 128 * 128)
    Lt, Lp = _pick_l_tile(L, min(_L_TILE_TARGET, lt_cap))
    # Grow Nb while blocks are still small (amortize per-grid-step overhead).
    while (nb < _MAX_NB and nb * 2 <= N
           and 2 * (nb * 2) * per_l * Lt <= block_budget
           and nb * per_l * Lt < (1 << 20)):
        nb *= 2
    return nb, _round_up(N, nb), Lt, Lp


def _stats_kernel(x_ref, sum_ref, sq_ref):
    """Pass 1: per-N-block partial per-channel sum / sum-of-squares over the L tiles."""
    @pl.when(pl.program_id(1) == 0)
    def _():
        sum_ref[...] = jnp.zeros_like(sum_ref)
        sq_ref[...] = jnp.zeros_like(sq_ref)

    x = x_ref[...].astype(jnp.float32)                 # (Nb, C_out, Lt)
    xc = jnp.sum(x, axis=0)                            # (C_out, Lt)  major-dim sum (VPU)
    x2c = jnp.sum(x * x, axis=0)                       # (C_out, Lt)
    sum_ref[...] += jnp.sum(xc, axis=1, keepdims=True)   # (C_out, 1)
    sq_ref[...] += jnp.sum(x2c, axis=1, keepdims=True)   # (C_out, 1)


def _apply_kernel(x_ref, cond_ref, w_ref, b_ref, o_ref, *, nb, c_out, c_pad):
    """Pass 2: folded-BN fused 1x1 conv + affine epilogue; one MXU matmul per batch row."""
    w = w_ref[...]                                     # (2*c_pad, C_in)
    b = b_ref[...]                                     # (2*c_pad, 1), f32
    for n in range(nb):                                # static unroll, nb <= 8
        cond = cond_ref[n]                             # (C_in, Lt)
        gb = jnp.dot(w, cond, preferred_element_type=jnp.float32) + b
        scale = gb[:c_out, :]                          # sublane-tile-aligned slices
        shift = gb[c_pad:c_pad + c_out, :]
        x = x_ref[n].astype(jnp.float32)               # (C_out, Lt)
        o_ref[n] = (x * scale + shift).astype(o_ref.dtype)


def conditional_batch_norm1d(inputs, conditions, wg, bg, wb, bb, *, matmul_in_bf16=False):
    """inputs: (N, C_out, L); conditions: (N, C_in, L)  [PyTorch NCL layout].
    wg, wb: (C_out, C_in) squeezed 1x1-conv weights; bg, bb: (C_out,) biases.
    matmul_in_bf16: cast conditions + folded weights to bf16 (halves cond HBM traffic,
    single-pass MXU on v5e) when accuracy allows; f32 accumulation is kept either way."""
    N, C_out, L = inputs.shape
    Nc, C_in, Lc = conditions.shape
    assert (Nc, Lc) == (N, L)

    out_dtype = inputs.dtype
    cond_dtype = jnp.bfloat16 if matmul_in_bf16 else conditions.dtype
    x_bytes = jnp.dtype(inputs.dtype).itemsize
    cond_bytes = jnp.dtype(cond_dtype).itemsize
    out_bytes = jnp.dtype(out_dtype).itemsize

    vmem_limit = _vmem_limit_bytes()
    C_pad = _round_up(C_out, 8)                        # keeps the beta slice aligned
    w_bytes = 2 * C_pad * C_in * cond_bytes
    # Budget for the double-buffered x/cond/out blocks (weights + headroom reserved).
    block_budget = max(8 * 1024 * 1024, vmem_limit - 2 * w_bytes - 8 * 1024 * 1024)

    Nb, Np, Lt, Lp = _choose_tiles(N, C_out, C_in, L, x_bytes, cond_bytes, out_bytes,
                                   block_budget)
    num_n, num_l = Np // Nb, Lp // Lt

    x = inputs
    cond = conditions.astype(cond_dtype)
    if (Np, Lp) != (N, L):
        x = jnp.pad(x, ((0, Np - N), (0, 0), (0, Lp - L)))
        cond = jnp.pad(cond, ((0, Np - N), (0, 0), (0, Lp - L)))

    x_spec = pl.BlockSpec((Nb, C_out, Lt), lambda n, l: (n, 0, l))
    cond_spec = pl.BlockSpec((Nb, C_in, Lt), lambda n, l: (n, 0, l))
    stat_spec = pl.BlockSpec((None, C_out, 1), lambda n, l: (n, 0, 0))
    # NOTE: w/b block index never changes; pipeline_mode=pl.Buffered(1) would save one
    # weight buffer of VMEM on v7x, kept default here for portability.
    w_spec = pl.BlockSpec((2 * C_pad, C_in), lambda n, l: (0, 0))
    b_spec = pl.BlockSpec((2 * C_pad, 1), lambda n, l: (0, 0))

    # ---- pass 1: per-N-block partial sums (N axis "parallel" -> both v7x TCs work) ----
    part_sum, part_sq = pl.pallas_call(
        _stats_kernel,
        grid=(num_n, num_l),
        in_specs=[x_spec],
        out_specs=[stat_spec, stat_spec],
        out_shape=[jax.ShapeDtypeStruct((num_n, C_out, 1), jnp.float32)] * 2,
        compiler_params=pltpu.CompilerParams(
            dimension_semantics=("parallel", "arbitrary"),
            vmem_limit_bytes=vmem_limit),
    )(x)

    # ---- finalize stats once; fold BN into the conv weights (tiny XLA ops) ----
    inv_count = 1.0 / float(N * L)       # true count: zero-padding does not bias stats
    mean = jnp.sum(part_sum, axis=(0, 2)) * inv_count                     # (C_out,)
    # TODO(synk): one-pass E[x^2]-mean^2 in f32 can cancel badly when |mean| >> std;
    # a shifted/Welford accumulation would be needed for such (non-zero-centered) inputs.
    var = jnp.sum(part_sq, axis=(0, 2)) * inv_count - mean * mean
    inv_std = jax.lax.rsqrt(var + EPS)
    ms = mean * inv_std

    wg32, wb32 = wg.astype(jnp.float32), wb.astype(jnp.float32)
    bg32, bb32 = bg.astype(jnp.float32), bb.astype(jnp.float32)
    w_cat = jnp.zeros((2 * C_pad, C_in), jnp.float32)
    w_cat = w_cat.at[:C_out].set(wg32 * inv_std[:, None])                 # folded gamma
    w_cat = w_cat.at[C_pad:C_pad + C_out].set(wb32 - wg32 * ms[:, None])  # folded beta
    b_cat = jnp.zeros((2 * C_pad, 1), jnp.float32)
    b_cat = b_cat.at[:C_out, 0].set(bg32 * inv_std)
    b_cat = b_cat.at[C_pad:C_pad + C_out, 0].set(bb32 - bg32 * ms)
    w_cat = w_cat.astype(cond_dtype)

    # ---- pass 2: fused conv + affine; fully independent tiles (megacore parallel) ----
    out = pl.pallas_call(
        functools.partial(_apply_kernel, nb=Nb, c_out=C_out, c_pad=C_pad),
        grid=(num_n, num_l),
        in_specs=[x_spec, cond_spec, w_spec, b_spec],
        out_specs=x_spec,
        out_shape=jax.ShapeDtypeStruct((Np, C_out, Lp), out_dtype),
        compiler_params=pltpu.CompilerParams(
            dimension_semantics=("parallel", "parallel"),
            vmem_limit_bytes=vmem_limit),
    )(x, cond, w_cat, b_cat)

    if (Np, Lp) != (N, L):
        out = out[:N, :, :L]
    return out


def reference(inputs, conditions, wg, bg, wb, bb):
    """Plain-JAX reference matching the PyTorch forward (training-mode BN)."""
    mean = jnp.mean(inputs, axis=(0, 2), keepdims=True)
    var = jnp.mean((inputs - mean) ** 2, axis=(0, 2), keepdims=True)
    x_norm = (inputs - mean) / jnp.sqrt(var + EPS)
    gamma = jnp.einsum('oc,ncl->nol', wg, conditions) + bg[None, :, None]
    beta = jnp.einsum('oc,ncl->nol', wb, conditions) + bb[None, :, None]
    return x_norm * gamma + beta


def _make_case(key, N, C_in, C_out, L):
    k_x, k_c, k_wg, k_bg, k_wb, k_bb = jax.random.split(key, 6)
    inputs = jax.random.normal(k_x, (N, C_out, L), dtype=jnp.float32)
    conditions = jax.random.normal(k_c, (N, C_in, L), dtype=jnp.float32)
    # Conv1d-style init: U(-k, k), k = 1/sqrt(C_in * kernel_size)
    bound = 1.0 / (C_in ** 0.5)
    wg = jax.random.uniform(k_wg, (C_out, C_in), minval=-bound, maxval=bound)
    bg = jax.random.uniform(k_bg, (C_out,), minval=-bound, maxval=bound)
    wb = jax.random.uniform(k_wb, (C_out, C_in), minval=-bound, maxval=bound)
    bb = jax.random.uniform(k_bb, (C_out,), minval=-bound, maxval=bound)
    return inputs, conditions, wg, bg, wb, bb


if __name__ == "__main__":
    key = jax.random.PRNGKey(0)
    k1, k2 = jax.random.split(key, 2)

    # Case 1: small shapes consistent with the module's forward (single-tile path).
    args1 = _make_case(k1, N=2, C_in=8, C_out=4, L=16)
    out1 = jax.block_until_ready(conditional_batch_norm1d(*args1))
    ref1 = reference(*args1)
    assert out1.shape == args1[0].shape
    assert jnp.allclose(out1, ref1, atol=1e-3, rtol=1e-3)

    # Case 2: exercises multi-tile grid (2 L-tiles), Nb batch blocking, N/L padding and
    # the aligned gamma/beta split (C_out=12 -> C_pad=16).
    args2 = _make_case(k2, N=3, C_in=24, C_out=12, L=2304)
    out2 = jax.block_until_ready(conditional_batch_norm1d(*args2))
    ref2 = reference(*args2)
    assert out2.shape == args2[0].shape
    assert jnp.allclose(out2, ref2, atol=1e-3, rtol=1e-3)

    print("KERNEL_OK")
</pallas_src>

<mosaic_0001>
module attributes {stable_mosaic.version = 11 : i64} {
  func.func @_stats_kernel(%arg0: i32, %arg1: i32, %arg2: memref<2x4x128xf32, #tpu.memory_space<vmem>>, %arg3: memref<1x4x1xf32, #tpu.memory_space<vmem>>, %arg4: memref<1x4x1xf32, #tpu.memory_space<vmem>>) attributes {dimension_semantics = [#tpu.dimension_semantics<parallel>, #tpu.dimension_semantics<arbitrary>], iteration_bounds = array<i64: 1, 1>, scalar_prefetch = 0 : i64, scratch_operands = 0 : i64, tpu.core_type = #tpu.core_type<tc>, window_params = [{transform_indices = @transform_0, window_bounds = array<i64: 2, 4, 128>}, {transform_indices = @transform_1, window_bounds = array<i64: 1, 4, 1>}, {transform_indices = @transform_2, window_bounds = array<i64: 1, 4, 1>}]} {
    %c0_i32 = arith.constant 0 : i32
    %0 = arith.cmpi eq, %arg1, %c0_i32 : i32
    %1 = arith.extui %0 : i1 to i32
    %c0_i32_0 = arith.constant 0 : i32
    %2 = arith.cmpi ne, %1, %c0_i32_0 : i32
    scf.if %2 {
      %cst_18 = arith.constant 0.000000e+00 : f32
      %23 = vector.broadcast %cst_18 : f32 to vector<4x1xf32>
      %c0_19 = arith.constant 0 : index
      %c0_20 = arith.constant 0 : index
      %c0_21 = arith.constant 0 : index
      %24 = vector.load %arg3[%c0_19, %c0_20, %c0_21] : memref<1x4x1xf32, #tpu.memory_space<vmem>>, vector<1x4x1xf32>
      %25 = vector.shape_cast %24 : vector<1x4x1xf32> to vector<4x1xf32>
      %26 = vector.shape_cast %23 : vector<4x1xf32> to vector<1x4x1xf32>
      tpu.vector_store %arg3[%c0_19, %c0_20, %c0_21], %26 {strides = array<i32>} : memref<1x4x1xf32, #tpu.memory_space<vmem>>, vector<1x4x1xf32>,
      %cst_22 = arith.constant 0.000000e+00 : f32
      %27 = vector.broadcast %cst_22 : f32 to vector<4x1xf32>
      %c0_23 = arith.constant 0 : index
      %c0_24 = arith.constant 0 : index
      %c0_25 = arith.constant 0 : index
      %28 = vector.load %arg4[%c0_23, %c0_24, %c0_25] : memref<1x4x1xf32, #tpu.memory_space<vmem>>, vector<1x4x1xf32>
      %29 = vector.shape_cast %28 : vector<1x4x1xf32> to vector<4x1xf32>
      %30 = vector.shape_cast %27 : vector<4x1xf32> to vector<1x4x1xf32>
      tpu.vector_store %arg4[%c0_23, %c0_24, %c0_25], %30 {strides = array<i32>} : memref<1x4x1xf32, #tpu.memory_space<vmem>>, vector<1x4x1xf32>,
    } else {
    }
    %c0 = arith.constant 0 : index
    %c0_1 = arith.constant 0 : index
    %c0_2 = arith.constant 0 : index
    %3 = vector.load %arg2[%c0, %c0_1, %c0_2] : memref<2x4x128xf32, #tpu.memory_space<vmem>>, vector<2x4x128xf32>
    %cst = arith.constant dense<0.000000e+00> : vector<4x128xf32>
    %4 = vector.multi_reduction <add>, %3, %cst [0] : vector<2x4x128xf32> to vector<4x128xf32>
    %5 = arith.mulf %3, %3 : vector<2x4x128xf32>
    %cst_3 = arith.constant dense<0.000000e+00> : vector<4x128xf32>
    %6 = vector.multi_reduction <add>, %5, %cst_3 [0] : vector<2x4x128xf32> to vector<4x128xf32>
    %c0_4 = arith.constant 0 : index
    %c0_5 = arith.constant 0 : index
    %c0_6 = arith.constant 0 : index
    %7 = vector.load %arg3[%c0_4, %c0_5, %c0_6] : memref<1x4x1xf32, #tpu.memory_space<vmem>>, vector<1x4x1xf32>
    %8 = vector.shape_cast %7 : vector<1x4x1xf32> to vector<4x1xf32>
    %cst_7 = arith.constant dense<0.000000e+00> : vector<4xf32>
    %9 = vector.multi_reduction <add>, %4, %cst_7 [1] : vector<4x128xf32> to vector<4xf32>
    %10 = vector.shape_cast %9 : vector<4xf32> to vector<4x1xf32>
    %11 = arith.addf %8, %10 : vector<4x1xf32>
    %c0_8 = arith.constant 0 : index
    %c0_9 = arith.constant 0 : index
    %c0_10 = arith.constant 0 : index
    %12 = vector.load %arg3[%c0_8, %c0_9, %c0_10] : memref<1x4x1xf32, #tpu.memory_space<vmem>>, vector<1x4x1xf32>
    %13 = vector.shape_cast %12 : vector<1x4x1xf32> to vector<4x1xf32>
    %14 = vector.shape_cast %11 : vector<4x1xf32> to vector<1x4x1xf32>
    tpu.vector_store %arg3[%c0_8, %c0_9, %c0_10], %14 {strides = array<i32>} : memref<1x4x1xf32, #tpu.memory_space<vmem>>, vector<1x4x1xf32>,
    %c0_11 = arith.constant 0 : index
    %c0_12 = arith.constant 0 : index
    %c0_13 = arith.constant 0 : index
    %15 = vector.load %arg4[%c0_11, %c0_12, %c0_13] : memref<1x4x1xf32, #tpu.memory_space<vmem>>, vector<1x4x1xf32>
    %16 = vector.shape_cast %15 : vector<1x4x1xf32> to vector<4x1xf32>
    %cst_14 = arith.constant dense<0.000000e+00> : vector<4xf32>
    %17 = vector.multi_reduction <add>, %6, %cst_14 [1] : vector<4x128xf32> to vector<4xf32>
    %18 = vector.shape_cast %17 : vector<4xf32> to vector<4x1xf32>
    %19 = arith.addf %16, %18 : vector<4x1xf32>
    %c0_15 = arith.constant 0 : index
    %c0_16 = arith.constant 0 : index
    %c0_17 = arith.constant 0 : index
    %20 = vector.load %arg4[%c0_15, %c0_16, %c0_17] : memref<1x4x1xf32, #tpu.memory_space<vmem>>, vector<1x4x1xf32>
    %21 = vector.shape_cast %20 : vector<1x4x1xf32> to vector<4x1xf32>
    %22 = vector.shape_cast %19 : vector<4x1xf32> to vector<1x4x1xf32>
    tpu.vector_store %arg4[%c0_15, %c0_16, %c0_17], %22 {strides = array<i32>} : memref<1x4x1xf32, #tpu.memory_space<vmem>>, vector<1x4x1xf32>,
    return
  }
  func.func @transform_0(%arg0: i32, %arg1: i32) -> (i32, i32, i32) {
    %c0_i32 = arith.constant 0 : i32
    %c0_i32_0 = arith.constant 0 : i32
    return %arg0, %c0_i32, %arg1 : i32, i32, i32
  }
  func.func @transform_1(%arg0: i32, %arg1: i32) -> (i32, i32, i32) {
    %c0_i32 = arith.constant 0 : i32
    %c0_i32_0 = arith.constant 0 : i32
    %c0_i32_1 = arith.constant 0 : i32
    return %arg0, %c0_i32, %c0_i32_0 : i32, i32, i32
  }
  func.func @transform_2(%arg0: i32, %arg1: i32) -> (i32, i32, i32) {
    %c0_i32 = arith.constant 0 : i32
    %c0_i32_0 = arith.constant 0 : i32
    %c0_i32_1 = arith.constant 0 : i32
    return %arg0, %c0_i32, %c0_i32_0 : i32, i32, i32
  }
}

</mosaic_0001>

<bundles_post_ra>
// kernel: tpu_custom_call.1
= control target key start
LH: loop header
LB: loop body
LE: loop exit
PB: predicated region body
PF: predicated region fallthrough
CT: control target
= control target key end

     0   :  { %8 = vsyncpa [#allocation3], 0  ;;  %s92_s9 = smov [#allocation2]   ;;  %s145_s0 = inlined_call_operand.hbm [shape: f32[2,4,128], index: 0, kind: input, shape index: {}]   ;;  %s146_s1 = inlined_call_operand.vmem [shape: f32[1,4,1], index: 1, kind: output, shape index: {0}]   ;;  %s147_s2 = inlined_call_operand.vmem [shape: f32[1,4,1], index: 2, kind: output, shape index: {1}]  }
   0x1   :  { %s14_s10 = sshll.u32 %s92_s9, 4  ;;  %s68_s13 = scalar_lea.hbm %s145_s0, 128  ;;  %s15_s10 = int_to_ptr.vmem [resolvable:$true] %s14_s10 }
   0x2   :  { %p69_p0 = scmp.ne.s32.totalorder %s145_s0, %s68_s13  ;;  %p72_p1 = scmp.lt.u32.totalorder %s68_s13, %s145_s0 }
   0x4   :  { %p74_p2 = pnand %p72_p1, %p69_p0 }
   0x6   :  { %77 = shalt.err (!%p74_p2)
}
   0x7   :  { %s78_s18 = scalar_lea.vmem %s15_s10, 128  ;;  %p83_p4 = scmp.lt.s32.totalorder %s15_s10, %s15_s10 }
   0x8   :  { %p79_p3 = scmp.ne.s32.totalorder %s15_s10, %s78_s18  ;;  %p84_p5 = scmp.lt.s32.totalorder %s78_s18, %s78_s18 }
   0xa   :  { %p85_p6 = por %p84_p5, %p83_p4 }
   0xc   :  { %p86_p7 = pnand %p85_p6, %p79_p3 }
   0xe   :  { %89 = shalt.err (!%p86_p7)
}
   0xf   :  { %s93_s19 = smov 64   ;;  %s94_s20 = smov 4  }
  0x10   :  { %20 = dma.hbm_to_vmem [thread:$0]  %s145_s0, 128, %s15_s10, [#allocation3], %s93_s19, %s93_s19, %s94_s20  }
  0x11   :  { %90 = dma.done.wait [#allocation3], 128  }
  0x12   :  { %91 = vsyncadd [#allocation3], 4294967168  ;;  %vm28_vm0 = vcmask 3072   ;;  %v95_v0 = vmov 0.0   ;;  %vm33_vm1 = vcmask 1043456  }
  0x13   :  { %29 = vst.msk [vmem:[%s146_s1] sm:$0xf] %vm28_vm0, %v95_v0  ;;  %30 = vst.msk [vmem:[%s147_s2] sm:$0xf] %vm28_vm0, %v95_v0  ;;  %v31_v1 = vld [vmem:[#allocation2] sm:$0xf] }
  0x14   :  { %v32_v2 = vld [vmem:[#allocation2 + $0x4] sm:$0xf]  ;;  %v34_v3 = vsel %vm33_vm1, %v31_v1, 0.0  ;;  %v37_v5 = vmul.f32 %v31_v1, %v31_v1 }
  0x15   :  { %v35_v4 = vsel %vm33_vm1, %v32_v2, 0.0  ;;  %v38_v6 = vmul.f32 %v32_v2, %v32_v2 }
  0x16   :  { %v36_v7 = vadd.f32 %v35_v4, %v34_v3  ;;  %v39_v8 = vsel %vm33_vm1, %v37_v5, 0.0 }
  0x17   :  { %v40_v9 = vsel %vm33_vm1, %v38_v6, 0.0 }
  0x18   :  { %v43_v10 = vsel %vm33_vm1, %v36_v7, 0.0  ;;  %v41_v11 = vadd.f32 %v40_v9, %v39_v8 }
  0x19   :  { %44 = vadd.xlane.f32.xlu0 %v43_v10 }
  0x1a   :  { %v50_v12 = vsel %vm33_vm1, %v41_v11, 0.0  ;;  %v42_v13 = vld [vmem:[%s146_s1] sm:$0xf] }
  0x1b   :  { %v49_v16 = vld [vmem:[%s147_s2] sm:$0xf] }
  0x1d   :  { %51 = vadd.xlane.f32.xlu0 %v50_v12 }
  0xa6   :  { %v45_v14 = vpop.xlane.xlu0 %44 }
  0xa7   :  { %v46_v15 = vadd.f32 %v45_v14, %v42_v13 }
  0xa9   :  { %48 = vst.msk [vmem:[%s146_s1] sm:$0xf] %vm28_vm0, %v46_v15 }
  0xaa   :  { %v52_v17 = vpop.xlane.xlu0 %51 }
  0xab   :  { %v53_v18 = vadd.f32 %v52_v17, %v49_v16 }
  0xad   :  { %54 = vst.msk [vmem:[%s147_s2] sm:$0xf] %vm28_vm0, %v53_v18 }
  0xae   :  { %63 = vsyncpa [#allocation3], 1 }

</bundles_post_ra>
